<compile_context>
chip_gen: v7x
topology: tpu7x:2x2x1
jax: 0.10.0
libtpu: 0.0.40
codegen_flags: <defaults>
</compile_context>

<pallas_src>
import jax
import jax.numpy as jnp
from jax.experimental import pallas as pl
from jax.experimental.pallas import tpu as pltpu

INPUT_DIM = 16
OUTPUT_DIM = 16
HIDDEN_DIM = max(INPUT_DIM // 2, 8)   # 8
N_NEURONS = 5                          # root, childA, leafA, childB, leafB
TILE_B = 128                           # rows per grid step


def _xavier_uniform(key, fan_in, fan_out):
    bound = (6.0 / (fan_in + fan_out)) ** 0.5
    return jax.random.uniform(key, (fan_in, fan_out), jnp.float32, -bound, bound)


def init_params(key):
    """Per-neuron xavier-uniform weights (in,out layout), zero biases."""
    w1s, w2s = [], []
    for _ in range(N_NEURONS):
        key, k1, k2 = jax.random.split(key, 3)
        w1s.append(_xavier_uniform(k1, INPUT_DIM, HIDDEN_DIM))    # (16, 8)
        w2s.append(_xavier_uniform(k2, HIDDEN_DIM, OUTPUT_DIM))   # (8, 16)
    w1 = jnp.stack(w1s)                                           # (5, 16, 8)
    b1 = jnp.zeros((N_NEURONS, 1, HIDDEN_DIM), jnp.float32)       # (5, 1, 8)
    w2 = jnp.stack(w2s)                                           # (5, 8, 16)
    b2 = jnp.zeros((N_NEURONS, 1, OUTPUT_DIM), jnp.float32)       # (5, 1, 16)
    return w1, b1, w2, b2


def _block_diag(a, b):
    ra, ca = a.shape
    rb, cb = b.shape
    top = jnp.concatenate([a, jnp.zeros((ra, cb), a.dtype)], axis=1)
    bot = jnp.concatenate([jnp.zeros((rb, ca), b.dtype), b], axis=1)
    return jnp.concatenate([top, bot], axis=0)


def fuse_params(w1, b1, w2, b2):
    """One-time weight prep: fuse branch A (neurons 1,2) and B (neurons 3,4)."""
    # root (neuron 0)
    w1r, b1r = w1[0], b1[0]                                   # (16,8), (1,8)
    w2r, b2r = w2[0], b2[0]                                   # (8,16), (1,16)
    # depth-1 children (neurons 1 and 3) fused: 16 -> 16 hidden -> 32 out
    w1c = jnp.concatenate([w1[1], w1[3]], axis=1)             # (16,16)
    b1c = jnp.concatenate([b1[1], b1[3]], axis=1)             # (1,16)
    w2c = _block_diag(w2[1], w2[3])                           # (16,32)
    b2c = jnp.concatenate([b2[1], b2[3]], axis=1)             # (1,32)
    # depth-2 leaves (neurons 2 and 4) fused: 32 -> 16 hidden -> 32 out
    w1l = _block_diag(w1[2], w1[4])                           # (32,16)
    b1l = jnp.concatenate([b1[2], b1[4]], axis=1)             # (1,16)
    w2l = _block_diag(w2[2], w2[4])                           # (16,32)
    b2l = jnp.concatenate([b2[2], b2[4]], axis=1)             # (1,32)
    return (w1r, b1r, w2r, b2r, w1c, b1c, w2c, b2c, w1l, b1l, w2l, b2l)


def _leaky(h):
    return jnp.where(h >= 0.0, h, 0.1 * h)


def fractal_kernel(x_ref,
                   w1r_ref, b1r_ref, w2r_ref, b2r_ref,
                   w1c_ref, b1c_ref, w2c_ref, b2c_ref,
                   w1l_ref, b1l_ref, w2l_ref, b2l_ref,
                   o_ref):
    x = x_ref[...]                                            # (TILE_B, 16) f32

    # root synapse
    h0 = _leaky(jnp.dot(x, w1r_ref[...], preferred_element_type=jnp.float32)
                + b1r_ref[...])
    y0 = jnp.tanh(jnp.dot(h0, w2r_ref[...], preferred_element_type=jnp.float32)
                  + b2r_ref[...])                             # (TILE_B, 16)

    # fused depth-1 children (A | B)
    hc = _leaky(jnp.dot(y0, w1c_ref[...], preferred_element_type=jnp.float32)
                + b1c_ref[...])                               # (TILE_B, 16)
    zc = jnp.tanh(jnp.dot(hc, w2c_ref[...], preferred_element_type=jnp.float32)
                  + b2c_ref[...])                             # (TILE_B, 32)

    # fused depth-2 leaves (A | B)
    hl = _leaky(jnp.dot(zc, w1l_ref[...], preferred_element_type=jnp.float32)
                + b1l_ref[...])                               # (TILE_B, 16)
    zl = jnp.tanh(jnp.dot(hl, w2l_ref[...], preferred_element_type=jnp.float32)
                  + b2l_ref[...])                             # (TILE_B, 32)

    # tanh outputs are already in [-1,1]; only the final mean needs clamping
    out_a = zl[:, :OUTPUT_DIM]
    out_b = zl[:, OUTPUT_DIM:]
    o_ref[...] = jnp.clip(0.5 * (out_a + out_b), -1.0, 1.0)
    # TODO(synk): memory_gate / state.memory / state.activation / state.energy are
    # stateful side effects of process_signal that never affect the returned tensor.


def _round_up(n, m):
    return ((n + m - 1) // m) * m


def fractal_forward(x, fused):
    squeeze = x.ndim == 1
    xb = (x[None, :] if squeeze else x).astype(jnp.float32)   # (B, 16)
    b = xb.shape[0]
    tile_b = min(TILE_B, _round_up(b, 8))
    bp = _round_up(b, tile_b)
    if bp != b:
        xb = jnp.pad(xb, ((0, bp - b), (0, 0)))

    const2d = lambda i: (0, 0)
    param_specs = [
        pl.BlockSpec(tuple(p.shape), const2d) for p in fused
    ]

    out = pl.pallas_call(
        fractal_kernel,
        out_shape=jax.ShapeDtypeStruct((bp, OUTPUT_DIM), jnp.float32),
        grid=(bp // tile_b,),
        in_specs=[pl.BlockSpec((tile_b, INPUT_DIM), lambda i: (i, 0))] + param_specs,
        out_specs=pl.BlockSpec((tile_b, OUTPUT_DIM), lambda i: (i, 0)),
        compiler_params=pltpu.CompilerParams(
            dimension_semantics=("parallel",)),
    )(xb, *fused)

    out = out[:b]
    return out[0] if squeeze else out


if __name__ == "__main__":
    key = jax.random.PRNGKey(0)
    pkey, xkey = jax.random.split(key)
    w1, b1, w2, b2 = init_params(pkey)
    fused = fuse_params(w1, b1, w2, b2)

    # batched input: 256 signals of 16 dims (2 grid steps of 128 rows)
    B = 256
    x = jax.random.normal(xkey, (B, INPUT_DIM), jnp.float32)

    fwd = jax.jit(fractal_forward)
    out = jax.block_until_ready(fwd(x, fused))
    assert out.shape == (B, OUTPUT_DIM) and out.dtype == jnp.float32

    # module-style single-vector call (padded to one 8-row tile inside wrapper)
    out1 = jax.block_until_ready(fwd(x[0], fused))
    assert out1.shape == (OUTPUT_DIM,)

    # pure-JAX unfused reference (matches the PyTorch module's returned tensor)
    def syn_ref(i, v):
        h = v @ w1[i] + b1[i]
        h = jnp.where(h >= 0.0, h, 0.1 * h)
        return jnp.tanh(h @ w2[i] + b2[i])

    y0 = syn_ref(0, x)
    refA = jnp.clip(syn_ref(2, syn_ref(1, y0)), -1.0, 1.0)
    refB = jnp.clip(syn_ref(4, syn_ref(3, y0)), -1.0, 1.0)
    ref = jnp.clip(0.5 * (refA + refB), -1.0, 1.0)

    assert jnp.allclose(out, ref, atol=1e-5), (out[:2], ref[:2])
    assert jnp.allclose(out1, ref[0], atol=1e-5), (out1, ref[0])

    print("KERNEL_OK")
</pallas_src>

<mosaic_0001>
module attributes {stable_mosaic.version = 11 : i64} {
  func.func @fractal_kernel(%arg0: i32, %arg1: memref<128x16xf32, #tpu.memory_space<vmem>>, %arg2: memref<16x8xf32, #tpu.memory_space<vmem>>, %arg3: memref<1x8xf32, #tpu.memory_space<vmem>>, %arg4: memref<8x16xf32, #tpu.memory_space<vmem>>, %arg5: memref<1x16xf32, #tpu.memory_space<vmem>>, %arg6: memref<16x16xf32, #tpu.memory_space<vmem>>, %arg7: memref<1x16xf32, #tpu.memory_space<vmem>>, %arg8: memref<16x32xf32, #tpu.memory_space<vmem>>, %arg9: memref<1x32xf32, #tpu.memory_space<vmem>>, %arg10: memref<32x16xf32, #tpu.memory_space<vmem>>, %arg11: memref<1x16xf32, #tpu.memory_space<vmem>>, %arg12: memref<16x32xf32, #tpu.memory_space<vmem>>, %arg13: memref<1x32xf32, #tpu.memory_space<vmem>>, %arg14: memref<128x16xf32, #tpu.memory_space<vmem>>) attributes {dimension_semantics = [#tpu.dimension_semantics<parallel>], iteration_bounds = array<i64: 2>, scalar_prefetch = 0 : i64, scratch_operands = 0 : i64, tpu.core_type = #tpu.core_type<tc>, window_params = [{transform_indices = @transform_0, window_bounds = array<i64: 128, 16>}, {pipeline_mode = #tpu.pipeline_mode<synchronous>, transform_indices = @transform_1, window_bounds = array<i64: 16, 8>}, {pipeline_mode = #tpu.pipeline_mode<synchronous>, transform_indices = @transform_2, window_bounds = array<i64: 1, 8>}, {pipeline_mode = #tpu.pipeline_mode<synchronous>, transform_indices = @transform_3, window_bounds = array<i64: 8, 16>}, {pipeline_mode = #tpu.pipeline_mode<synchronous>, transform_indices = @transform_4, window_bounds = array<i64: 1, 16>}, {pipeline_mode = #tpu.pipeline_mode<synchronous>, transform_indices = @transform_5, window_bounds = array<i64: 16, 16>}, {pipeline_mode = #tpu.pipeline_mode<synchronous>, transform_indices = @transform_6, window_bounds = array<i64: 1, 16>}, {pipeline_mode = #tpu.pipeline_mode<synchronous>, transform_indices = @transform_7, window_bounds = array<i64: 16, 32>}, {pipeline_mode = #tpu.pipeline_mode<synchronous>, transform_indices = @transform_8, window_bounds = array<i64: 1, 32>}, {pipeline_mode = #tpu.pipeline_mode<synchronous>, transform_indices = @transform_9, window_bounds = array<i64: 32, 16>}, {pipeline_mode = #tpu.pipeline_mode<synchronous>, transform_indices = @transform_10, window_bounds = array<i64: 1, 16>}, {pipeline_mode = #tpu.pipeline_mode<synchronous>, transform_indices = @transform_11, window_bounds = array<i64: 16, 32>}, {pipeline_mode = #tpu.pipeline_mode<synchronous>, transform_indices = @transform_12, window_bounds = array<i64: 1, 32>}, {transform_indices = @transform_13, window_bounds = array<i64: 128, 16>}]} {
    %c0 = arith.constant 0 : index
    %c0_0 = arith.constant 0 : index
    %0 = vector.load %arg1[%c0, %c0_0] : memref<128x16xf32, #tpu.memory_space<vmem>>, vector<128x16xf32>
    %c0_1 = arith.constant 0 : index
    %c0_2 = arith.constant 0 : index
    %1 = vector.load %arg2[%c0_1, %c0_2] : memref<16x8xf32, #tpu.memory_space<vmem>>, vector<16x8xf32>
    %cst = arith.constant dense<0.000000e+00> : vector<128x8xf32>
    %2 = tpu.matmul %0, %1, %cst {dimension_numbers = #tpu.dot_dimension_numbers<[1], [0], [0], [1], [0, 0, 1, 1], [], []>} : vector<128x16xf32>, vector<16x8xf32>, vector<128x8xf32> -> vector<128x8xf32>
    %c0_3 = arith.constant 0 : index
    %c0_4 = arith.constant 0 : index
    %3 = vector.load %arg3[%c0_3, %c0_4] : memref<1x8xf32, #tpu.memory_space<vmem>>, vector<1x8xf32>
    %4 = vector.broadcast %3 : vector<1x8xf32> to vector<128x8xf32>
    %5 = arith.addf %2, %4 : vector<128x8xf32>
    %cst_5 = arith.constant 0.000000e+00 : f32
    %6 = vector.broadcast %cst_5 : f32 to vector<128x8xf32>
    %7 = arith.cmpf oge, %5, %6 : vector<128x8xf32>
    %cst_6 = arith.constant 1.000000e-01 : f32
    %8 = vector.broadcast %cst_6 : f32 to vector<128x8xf32>
    %9 = arith.mulf %8, %5 : vector<128x8xf32>
    %10 = arith.select %7, %5, %9 : vector<128x8xi1>, vector<128x8xf32>
    %c0_7 = arith.constant 0 : index
    %c0_8 = arith.constant 0 : index
    %11 = vector.load %arg4[%c0_7, %c0_8] : memref<8x16xf32, #tpu.memory_space<vmem>>, vector<8x16xf32>
    %cst_9 = arith.constant dense<0.000000e+00> : vector<128x16xf32>
    %12 = tpu.matmul %10, %11, %cst_9 {dimension_numbers = #tpu.dot_dimension_numbers<[1], [0], [0], [1], [0, 0, 1, 1], [], []>} : vector<128x8xf32>, vector<8x16xf32>, vector<128x16xf32> -> vector<128x16xf32>
    %c0_10 = arith.constant 0 : index
    %c0_11 = arith.constant 0 : index
    %13 = vector.load %arg5[%c0_10, %c0_11] : memref<1x16xf32, #tpu.memory_space<vmem>>, vector<1x16xf32>
    %14 = vector.broadcast %13 : vector<1x16xf32> to vector<128x16xf32>
    %15 = arith.addf %12, %14 : vector<128x16xf32>
    %16 = math.tanh %15 : vector<128x16xf32>
    %c0_12 = arith.constant 0 : index
    %c0_13 = arith.constant 0 : index
    %17 = vector.load %arg6[%c0_12, %c0_13] : memref<16x16xf32, #tpu.memory_space<vmem>>, vector<16x16xf32>
    %cst_14 = arith.constant dense<0.000000e+00> : vector<128x16xf32>
    %18 = tpu.matmul %16, %17, %cst_14 {dimension_numbers = #tpu.dot_dimension_numbers<[1], [0], [0], [1], [0, 0, 1, 1], [], []>} : vector<128x16xf32>, vector<16x16xf32>, vector<128x16xf32> -> vector<128x16xf32>
    %c0_15 = arith.constant 0 : index
    %c0_16 = arith.constant 0 : index
    %19 = vector.load %arg7[%c0_15, %c0_16] : memref<1x16xf32, #tpu.memory_space<vmem>>, vector<1x16xf32>
    %20 = vector.broadcast %19 : vector<1x16xf32> to vector<128x16xf32>
    %21 = arith.addf %18, %20 : vector<128x16xf32>
    %cst_17 = arith.constant 0.000000e+00 : f32
    %22 = vector.broadcast %cst_17 : f32 to vector<128x16xf32>
    %23 = arith.cmpf oge, %21, %22 : vector<128x16xf32>
    %cst_18 = arith.constant 1.000000e-01 : f32
    %24 = vector.broadcast %cst_18 : f32 to vector<128x16xf32>
    %25 = arith.mulf %24, %21 : vector<128x16xf32>
    %26 = arith.select %23, %21, %25 : vector<128x16xi1>, vector<128x16xf32>
    %c0_19 = arith.constant 0 : index
    %c0_20 = arith.constant 0 : index
    %27 = vector.load %arg8[%c0_19, %c0_20] : memref<16x32xf32, #tpu.memory_space<vmem>>, vector<16x32xf32>
    %cst_21 = arith.constant dense<0.000000e+00> : vector<128x32xf32>
    %28 = tpu.matmul %26, %27, %cst_21 {dimension_numbers = #tpu.dot_dimension_numbers<[1], [0], [0], [1], [0, 0, 1, 1], [], []>} : vector<128x16xf32>, vector<16x32xf32>, vector<128x32xf32> -> vector<128x32xf32>
    %c0_22 = arith.constant 0 : index
    %c0_23 = arith.constant 0 : index
    %29 = vector.load %arg9[%c0_22, %c0_23] : memref<1x32xf32, #tpu.memory_space<vmem>>, vector<1x32xf32>
    %30 = vector.broadcast %29 : vector<1x32xf32> to vector<128x32xf32>
    %31 = arith.addf %28, %30 : vector<128x32xf32>
    %32 = math.tanh %31 : vector<128x32xf32>
    %c0_24 = arith.constant 0 : index
    %c0_25 = arith.constant 0 : index
    %33 = vector.load %arg10[%c0_24, %c0_25] : memref<32x16xf32, #tpu.memory_space<vmem>>, vector<32x16xf32>
    %cst_26 = arith.constant dense<0.000000e+00> : vector<128x16xf32>
    %34 = tpu.matmul %32, %33, %cst_26 {dimension_numbers = #tpu.dot_dimension_numbers<[1], [0], [0], [1], [0, 0, 1, 1], [], []>} : vector<128x32xf32>, vector<32x16xf32>, vector<128x16xf32> -> vector<128x16xf32>
    %c0_27 = arith.constant 0 : index
    %c0_28 = arith.constant 0 : index
    %35 = vector.load %arg11[%c0_27, %c0_28] : memref<1x16xf32, #tpu.memory_space<vmem>>, vector<1x16xf32>
    %36 = vector.broadcast %35 : vector<1x16xf32> to vector<128x16xf32>
    %37 = arith.addf %34, %36 : vector<128x16xf32>
    %cst_29 = arith.constant 0.000000e+00 : f32
    %38 = vector.broadcast %cst_29 : f32 to vector<128x16xf32>
    %39 = arith.cmpf oge, %37, %38 : vector<128x16xf32>
    %cst_30 = arith.constant 1.000000e-01 : f32
    %40 = vector.broadcast %cst_30 : f32 to vector<128x16xf32>
    %41 = arith.mulf %40, %37 : vector<128x16xf32>
    %42 = arith.select %39, %37, %41 : vector<128x16xi1>, vector<128x16xf32>
    %c0_31 = arith.constant 0 : index
    %c0_32 = arith.constant 0 : index
    %43 = vector.load %arg12[%c0_31, %c0_32] : memref<16x32xf32, #tpu.memory_space<vmem>>, vector<16x32xf32>
    %cst_33 = arith.constant dense<0.000000e+00> : vector<128x32xf32>
    %44 = tpu.matmul %42, %43, %cst_33 {dimension_numbers = #tpu.dot_dimension_numbers<[1], [0], [0], [1], [0, 0, 1, 1], [], []>} : vector<128x16xf32>, vector<16x32xf32>, vector<128x32xf32> -> vector<128x32xf32>
    %c0_34 = arith.constant 0 : index
    %c0_35 = arith.constant 0 : index
    %45 = vector.load %arg13[%c0_34, %c0_35] : memref<1x32xf32, #tpu.memory_space<vmem>>, vector<1x32xf32>
    %46 = vector.broadcast %45 : vector<1x32xf32> to vector<128x32xf32>
    %47 = arith.addf %44, %46 : vector<128x32xf32>
    %48 = math.tanh %47 : vector<128x32xf32>
    %49 = vector.extract_strided_slice %48 {offsets = [0, 0], sizes = [128, 16], strides = [1, 1]} : vector<128x32xf32> to vector<128x16xf32>
    %50 = vector.extract_strided_slice %48 {offsets = [0, 16], sizes = [128, 16], strides = [1, 1]} : vector<128x32xf32> to vector<128x16xf32>
    %51 = arith.addf %49, %50 : vector<128x16xf32>
    %cst_36 = arith.constant 5.000000e-01 : f32
    %52 = vector.broadcast %cst_36 : f32 to vector<128x16xf32>
    %53 = arith.mulf %52, %51 : vector<128x16xf32>
    %cst_37 = arith.constant -1.000000e+00 : f32
    %cst_38 = arith.constant 1.000000e+00 : f32
    %54 = vector.broadcast %cst_37 : f32 to vector<128x16xf32>
    %55 = arith.maximumf %54, %53 : vector<128x16xf32>
    %56 = vector.broadcast %cst_38 : f32 to vector<128x16xf32>
    %57 = arith.minimumf %56, %55 : vector<128x16xf32>
    %c0_39 = arith.constant 0 : index
    %c0_40 = arith.constant 0 : index
    %58 = vector.load %arg14[%c0_39, %c0_40] : memref<128x16xf32, #tpu.memory_space<vmem>>, vector<128x16xf32>
    tpu.vector_store %arg14[%c0_39, %c0_40], %57 {strides = array<i32>} : memref<128x16xf32, #tpu.memory_space<vmem>>, vector<128x16xf32>,
    return
  }
  func.func @transform_0(%arg0: i32) -> (i32, i32) {
    %c0_i32 = arith.constant 0 : i32
    %c0_i32_0 = arith.constant 0 : i32
    return %arg0, %c0_i32 : i32, i32
  }
  func.func @transform_1(%arg0: i32) -> (i32, i32) {
    %c0_i32 = arith.constant 0 : i32
    %c0_i32_0 = arith.constant 0 : i32
    %c0_i32_1 = arith.constant 0 : i32
    return %c0_i32, %c0_i32_0 : i32, i32
  }
  func.func @transform_2(%arg0: i32) -> (i32, i32) {
    %c0_i32 = arith.constant 0 : i32
    %c0_i32_0 = arith.constant 0 : i32
    %c0_i32_1 = arith.constant 0 : i32
    return %c0_i32, %c0_i32_0 : i32, i32
  }
  func.func @transform_3(%arg0: i32) -> (i32, i32) {
    %c0_i32 = arith.constant 0 : i32
    %c0_i32_0 = arith.constant 0 : i32
    %c0_i32_1 = arith.constant 0 : i32
    return %c0_i32, %c0_i32_0 : i32, i32
  }
  func.func @transform_4(%arg0: i32) -> (i32, i32) {
    %c0_i32 = arith.constant 0 : i32
    %c0_i32_0 = arith.constant 0 : i32
    %c0_i32_1 = arith.constant 0 : i32
    return %c0_i32, %c0_i32_0 : i32, i32
  }
  func.func @transform_5(%arg0: i32) -> (i32, i32) {
    %c0_i32 = arith.constant 0 : i32
    %c0_i32_0 = arith.constant 0 : i32
    %c0_i32_1 = arith.constant 0 : i32
    return %c0_i32, %c0_i32_0 : i32, i32
  }
  func.func @transform_6(%arg0: i32) -> (i32, i32) {
    %c0_i32 = arith.constant 0 : i32
    %c0_i32_0 = arith.constant 0 : i32
    %c0_i32_1 = arith.constant 0 : i32
    return %c0_i32, %c0_i32_0 : i32, i32
  }
  func.func @transform_7(%arg0: i32) -> (i32, i32) {
    %c0_i32 = arith.constant 0 : i32
    %c0_i32_0 = arith.constant 0 : i32
    %c0_i32_1 = arith.constant 0 : i32
    return %c0_i32, %c0_i32_0 : i32, i32
  }
  func.func @transform_8(%arg0: i32) -> (i32, i32) {
    %c0_i32 = arith.constant 0 : i32
    %c0_i32_0 = arith.constant 0 : i32
    %c0_i32_1 = arith.constant 0 : i32
    return %c0_i32, %c0_i32_0 : i32, i32
  }
  func.func @transform_9(%arg0: i32) -> (i32, i32) {
    %c0_i32 = arith.constant 0 : i32
    %c0_i32_0 = arith.constant 0 : i32
    %c0_i32_1 = arith.constant 0 : i32
    return %c0_i32, %c0_i32_0 : i32, i32
  }
  func.func @transform_10(%arg0: i32) -> (i32, i32) {
    %c0_i32 = arith.constant 0 : i32
    %c0_i32_0 = arith.constant 0 : i32
    %c0_i32_1 = arith.constant 0 : i32
    return %c0_i32, %c0_i32_0 : i32, i32
  }
  func.func @transform_11(%arg0: i32) -> (i32, i32) {
    %c0_i32 = arith.constant 0 : i32
    %c0_i32_0 = arith.constant 0 : i32
    %c0_i32_1 = arith.constant 0 : i32
    return %c0_i32, %c0_i32_0 : i32, i32
  }
  func.func @transform_12(%arg0: i32) -> (i32, i32) {
    %c0_i32 = arith.constant 0 : i32
    %c0_i32_0 = arith.constant 0 : i32
    %c0_i32_1 = arith.constant 0 : i32
    return %c0_i32, %c0_i32_0 : i32, i32
  }
  func.func @transform_13(%arg0: i32) -> (i32, i32) {
    %c0_i32 = arith.constant 0 : i32
    %c0_i32_0 = arith.constant 0 : i32
    return %arg0, %c0_i32 : i32, i32
  }
}

</mosaic_0001>

<bundles_post_ra>
// kernel: fractal_forward.1
= control target key start
LH: loop header
LB: loop body
LE: loop exit
PB: predicated region body
PF: predicated region fallthrough
CT: control target
= control target key end

     0   :  { %s2684_s25 = smov 0   ;;  %s3065_s0 = inlined_call_operand.vmem [shape: f32[256,16], index: 0, kind: input, shape index: {}]   ;;  %s3066_s1 = inlined_call_operand.vmem [shape: f32[16,8], index: 1, kind: input, shape index: {}]   ;;  %s3067_s2 = inlined_call_operand.vmem [shape: f32[1,8], index: 2, kind: input, shape index: {}]   ;;  %s3068_s3 = inlined_call_operand.vmem [shape: f32[8,16], index: 3, kind: input, shape index: {}]   ;;  %s3069_s4 = inlined_call_operand.vmem [shape: f32[1,16], index: 4, kind: input, shape index: {}]   ;;  %s3070_s5 = inlined_call_operand.vmem [shape: f32[16,16], index: 5, kind: input, shape index: {}]   ;;  %s3071_s6 = inlined_call_operand.vmem [shape: f32[1,16], index: 6, kind: input, shape index: {}]   ;;  %s3072_s7 = inlined_call_operand.vmem [shape: f32[16,32], index: 7, kind: input, shape index: {}]   ;;  %s3073_s8 = inlined_call_operand.vmem [shape: f32[1,32], index: 8, kind: input, shape index: {}]   ;;  %s3074_s9 = inlined_call_operand.vmem [shape: f32[32,16], index: 9, kind: input, shape index: {}]   ;;  %s3075_s10 = inlined_call_operand.vmem [shape: f32[1,16], index: 10, kind: input, shape index: {}]   ;;  %s3076_s11 = inlined_call_operand.vmem [shape: f32[16,32], index: 11, kind: input, shape index: {}]   ;;  %s3077_s12 = inlined_call_operand.vmem [shape: f32[1,32], index: 12, kind: input, shape index: {}]   ;;  %s3078_s13 = inlined_call_operand.vmem [shape: f32[256,16], index: 13, kind: output, shape index: {}]  }
   0x1 LB: > { %s2068_s26 = sadd.s32 4294967295, %s2611_s25   ;;  %p2072_p0 = scmp.ge.s32.totalorder %s2611_s25, 1  ;;  %s2611_s25 = sphi %s2684_s25, %s23_s25  }
   0x2   : > { %p388_p1 = scmp.lt.s32.totalorder %s2611_s25, 3 }
   0x4   : > { %p389_p2 = pnand %p2072_p0, %p388_p1 }
   0x5   : > { %v460_v0 = vld [vmem:[%s3066_s1] sm:$0xff] (!%p389_p2)  ;;  %v461_v1 = vld [vmem:[%s3066_s1 + $0x8] sm:$0xff] (!%p389_p2)  ;;  %s2073_s14 = sshll.u32 (!%p389_p2), %s2068_s26, 4  ;;  %vm469_vm0 = vcmask (!%p389_p2), 130048   ;;  %vm719_vm3 = vcmask (!%p389_p2), 64512   ;;  %s2613_s26 = smov (!%p389_p2), 112  }
   0x6   : > { %392 = sbr.rel (%p389_p2) target bundleno = 1508 (0x5e4), region = 72  ;;  %v2476_v2 = vpack.c.bf16 (!%p389_p2), %v461_v1, %v460_v0  ;;  %p433_p3 = scmp.lt.s32.totalorder (!%p389_p2), %s2073_s14, 31  ;;  %v711_v19 = vld [vmem:[%s3068_s3] sm:$0xff] (!%p389_p2)  ;;  %v930_v21 = vld [vmem:[%s3070_s5 + $0x8] sm:$0xff] (!%p389_p2) }
   0x7   : > { %2334 = vmatprep.subr.mxu1 (!%p389_p2), %v711_v19  ;;  %v929_v20 = vld [vmem:[%s3070_s5] sm:$0xff] (!%p389_p2) }
   0x8   : > { %2477 = vmatprep.subr.bf16.mxu0 (!%p389_p2), %v2476_v2  ;;  %2335 = vmatpush3.msra.mxu1 (!%p389_p2), %v711_v19  ;;  %v2480_v22 = vpack.c.bf16 (!%p389_p2), %v930_v21, %v929_v20  ;;  %v2752_v23 = vld [vmem:[%s3067_s2] ss:$0 sm:$0xff] (!%p389_p2) }
   0x9   : > { %2479 = vmatpush3.bf16.msra.mxu0 (!%p389_p2), %v2476_v2 }
   0xa   : > { %2481 = vmatprep.subr.bf16.mxu1 (!%p389_p2), %v2480_v22 }
   0xd   : > { %s3080_s14 = smov (!%p433_p3, %s2073_s14), 31 }
   0xe   : > { %s2074_s15 = sshll.u32 %s3080_s14, 3 }
   0xf   : > { %s2706_s18 = scalar_lea.vmem %s3065_s0, %s2074_s15  ;;  %s3022_s29 = scalar_lea.vmem %s3078_s13, %s2074_s15 }
  0x10   : > { %v444_v3 = vld [vmem:[%s2706_s18] sm:$0xff]  ;;  %v445_v4 = vld [vmem:[%s2706_s18 + $0x8] sm:$0xff]  ;;  %v446_v5 = vld [vmem:[%s2706_s18 + $0x10] sm:$0xff] }
  0x11   : > { %2310 = vmatprep.mubr.msk.f32.mxu0 %vm469_vm0, %v444_v3  ;;  %v447_v6 = vld [vmem:[%s2706_s18 + $0x18] sm:$0xff]  ;;  %v448_v7 = vld [vmem:[%s2706_s18 + $0x20] sm:$0xff]  ;;  %v449_v8 = vld [vmem:[%s2706_s18 + $0x28] sm:$0xff] }
  0x12   : > { %2311 = vmatmul.mubr.msk.f32.vlgmr.msra.gmra.mrb[0].mxu0 %vm469_vm0, %v445_v4  ;;  %v450_v9 = vld [vmem:[%s2706_s18 + $0x30] sm:$0xff]  ;;  %v451_v10 = vld [vmem:[%s2706_s18 + $0x38] sm:$0xff]  ;;  %v452_v11 = vld [vmem:[%s2706_s18 + $0x40] sm:$0xff] }
  0x13   : > { %2313 = vmatprep.mubr.msk.f32.mxu0 %vm469_vm0, %v446_v5  ;;  %v453_v12 = vld [vmem:[%s2706_s18 + $0x48] sm:$0xff]  ;;  %v454_v13 = vld [vmem:[%s2706_s18 + $0x50] sm:$0xff]  ;;  %v455_v14 = vld [vmem:[%s2706_s18 + $0x58] sm:$0xff] }
  0x14   : > { %v456_v15 = vld [vmem:[%s2706_s18 + $0x60] sm:$0xff]  ;;  %v457_v16 = vld [vmem:[%s2706_s18 + $0x68] sm:$0xff]  ;;  %v458_v17 = vld [vmem:[%s2706_s18 + $0x70] sm:$0xff] }
  0x15   : > { %v459_v18 = vld [vmem:[%s2706_s18 + $0x78] sm:$0xff] }
  0x16   : > { %2314 = vmatmul.mubr.msk.f32.gmra.mrb[2].mxu0 %vm469_vm0, %v447_v6 }
  0x17   : > { %2316 = vmatprep.mubr.msk.f32.mxu0 %vm469_vm0, %v448_v7 }
  0x1a   : > { %2317 = vmatmul.mubr.msk.f32.gmra.mrb[4].mxu0 %vm469_vm0, %v449_v8 }
  0x1b   : > { %2319 = vmatprep.mubr.msk.f32.mxu0 %vm469_vm0, %v450_v9 }
  0x1e   : > { %2320 = vmatmul.mubr.msk.f32.gmra.mrb[6].mxu0 %vm469_vm0, %v451_v10 }
  0x1f   : > { %2322 = vmatprep.mubr.msk.f32.mxu0 %vm469_vm0, %v452_v11 }
  0x22   : > { %2323 = vmatmul.mubr.msk.f32.gmra.mrb[8].mxu0 %vm469_vm0, %v453_v12 }
  0x23   : > { %2325 = vmatprep.mubr.msk.f32.mxu0 %vm469_vm0, %v454_v13 }
  0x26   : > { %2326 = vmatmul.mubr.msk.f32.gmra.mrb[10].mxu0 %vm469_vm0, %v455_v14 }
  0x27   : > { %2328 = vmatprep.mubr.msk.f32.mxu0 %vm469_vm0, %v456_v15 }
  0x2a   : > { %2329 = vmatmul.mubr.msk.f32.gmra.mrb[12].mxu0 %vm469_vm0, %v457_v16 }
  0x2b   : > { %2331 = vmatprep.mubr.msk.f32.mxu0 %vm469_vm0, %v458_v17 }
  0x2e   : > { %2332 = vmatmul.mubr.msk.f32.gmra.mrb[14].mxu0 %vm469_vm0, %v459_v18 }
  0xe5   : > { %v2312_v24 = vpop.f32.mrb[0].mxu0 }
  0xe6   : > { %v590_v25 = vadd.f32 %v2312_v24, %v2752_v23  ;;  %v584_v26 = vpop.f32.mrb[1].mxu0 }
  0xe7   : > { %v585_v27 = vadd.f32 %v2752_v23, %v584_v26 }
  0xe8   : > { %v680_v28 = vmul.f32 0.1, %v590_v25  ;;  %vm664_vm1 = vcmp.ge.f32.partialorder %v590_v25, 0.0 }
  0xe9   : > { %v2315_v29 = vpop.f32.mrb[2].mxu0  ;;  %vm663_vm2 = vcmp.ge.f32.partialorder %v585_v27, 0.0  ;;  %v679_v30 = vmul.f32 0.1, %v585_v27 }
  0xea   : > { %v600_v31 = vadd.f32 %v2315_v29, %v2752_v23  ;;  %v594_v32 = vpop.f32.mrb[3].mxu0  ;;  %v696_v36 = vsel %vm664_vm1, %v590_v25, %v680_v28  ;;  %v1179_v25 = vld [vmem:[%s3072_s7] sm:$0xff] }
  0xeb   : > { %v595_v33 = vadd.f32 %v2752_v23, %v594_v32  ;;  %v695_v34 = vsel %vm663_vm2, %v585_v27, %v679_v30  ;;  %v2795_v27 = vld [vmem:[%s3069_s4] ss:$0 sm:$0xff] }
  0xec   : > { %v682_v35 = vmul.f32 0.1, %v600_v31  ;;  %2336 = vmatprep.mubr.msk.f32.mxu1 %vm719_vm3, %v695_v34  ;;  %vm666_vm4 = vcmp.ge.f32.partialorder %v600_v31, 0.0 }
  0xed   : > { %vm665_vm5 = vcmp.ge.f32.partialorder %v595_v33, 0.0  ;;  %v681_v37 = vmul.f32 0.1, %v595_v33  ;;  %v2318_v38 = vpop.f32.mrb[4].mxu0  ;;  %2337 = vmatmul.mubr.msk.f32.vlgmr.msra.gmra.mrb[0].mxu1 %vm719_vm3, %v696_v36 }
  0xee   : > { %v610_v39 = vadd.f32 %v2318_v38, %v2752_v23  ;;  %v604_v40 = vpop.f32.mrb[5].mxu0  ;;  %2483 = vmatpush3.bf16.msra.mxu1 %v2480_v22  ;;  %v698_v44 = vsel %vm666_vm4, %v600_v31, %v682_v35 }
  0xef   : > { %v605_v41 = vadd.f32 %v2752_v23, %v604_v40  ;;  %v697_v42 = vsel %vm665_vm5, %v595_v33, %v681_v37 }
  0xf0   : > { %vm668_vm6 = vcmp.ge.f32.partialorder %v610_v39, 0.0  ;;  %v684_v43 = vmul.f32 0.1, %v610_v39  ;;  %2339 = vmatprep.mubr.msk.f32.mxu1 %vm719_vm3, %v697_v42 }
  0xf1   : > { %vm667_vm7 = vcmp.ge.f32.partialorder %v605_v41, 0.0  ;;  %v683_v45 = vmul.f32 0.1, %v605_v41  ;;  %v2321_v46 = vpop.f32.mrb[6].mxu0  ;;  %2340 = vmatmul.mubr.msk.f32.gmra.mrb[2].mxu1 %vm719_vm3, %v698_v44 }
  0xf2   : > { %v620_v47 = vadd.f32 %v2321_v46, %v2752_v23  ;;  %v614_v48 = vpop.f32.mrb[7].mxu0  ;;  %v700_v49 = vsel %vm668_vm6, %v610_v39, %v684_v43 }
  0xf3   : > { %v615_v50 = vadd.f32 %v2752_v23, %v614_v48  ;;  %v699_v51 = vsel %vm667_vm7, %v605_v41, %v683_v45 }
  0xf4   : > { %vm670_vm8 = vcmp.ge.f32.partialorder %v620_v47, 0.0  ;;  %v686_v52 = vmul.f32 0.1, %v620_v47  ;;  %2342 = vmatprep.mubr.msk.f32.mxu1 %vm719_vm3, %v699_v51 }
  0xf5   : > { %vm669_vm9 = vcmp.ge.f32.partialorder %v615_v50, 0.0  ;;  %v685_v53 = vmul.f32 0.1, %v615_v50  ;;  %v2324_v54 = vpop.f32.mrb[8].mxu0  ;;  %2343 = vmatmul.mubr.msk.f32.gmra.mrb[4].mxu1 %vm719_vm3, %v700_v49 }
  0xf6   : > { %v630_v55 = vadd.f32 %v2324_v54, %v2752_v23  ;;  %v624_v56 = vpop.f32.mrb[9].mxu0  ;;  %v702_v57 = vsel %vm670_vm8, %v620_v47, %v686_v52 }
  0xf7   : > { %v625_v58 = vadd.f32 %v2752_v23, %v624_v56  ;;  %v701_v59 = vsel %vm669_vm9, %v615_v50, %v685_v53 }
  0xf8   : > { %vm672_vm10 = vcmp.ge.f32.partialorder %v630_v55, 0.0  ;;  %v688_v60 = vmul.f32 0.1, %v630_v55  ;;  %2345 = vmatprep.mubr.msk.f32.mxu1 %vm719_vm3, %v701_v59 }
  0xf9   : > { %vm671_vm11 = vcmp.ge.f32.partialorder %v625_v58, 0.0  ;;  %v687_v61 = vmul.f32 0.1, %v625_v58  ;;  %v2327_v62 = vpop.f32.mrb[10].mxu0  ;;  %2346 = vmatmul.mubr.msk.f32.gmra.mrb[6].mxu1 %vm719_vm3, %v702_v57 }
  0xfa   : > { %v640_v63 = vadd.f32 %v2327_v62, %v2752_v23  ;;  %v634_v0 = vpop.f32.mrb[11].mxu0  ;;  %v704_v1 = vsel %vm672_vm10, %v630_v55, %v688_v60 }
  0xfb   : > { %v635_v2 = vadd.f32 %v2752_v23, %v634_v0  ;;  %v703_v3 = vsel %vm671_vm11, %v625_v58, %v687_v61 }
  0xfc   : > { %vm674_vm12 = vcmp.ge.f32.partialorder %v640_v63, 0.0  ;;  %v690_v4 = vmul.f32 0.1, %v640_v63  ;;  %2348 = vmatprep.mubr.msk.f32.mxu1 %vm719_vm3, %v703_v3 }
  0xfd   : > { %vm673_vm13 = vcmp.ge.f32.partialorder %v635_v2, 0.0  ;;  %v689_v5 = vmul.f32 0.1, %v635_v2  ;;  %v2330_v6 = vpop.f32.mrb[12].mxu0  ;;  %2349 = vmatmul.mubr.msk.f32.gmra.mrb[8].mxu1 %vm719_vm3, %v704_v1 }
  0xfe   : > { %v650_v7 = vadd.f32 %v2330_v6, %v2752_v23  ;;  %v644_v8 = vpop.f32.mrb[13].mxu0  ;;  %v706_v9 = vsel %vm674_vm12, %v640_v63, %v690_v4 }
  0xff   : > { %v645_v10 = vadd.f32 %v2752_v23, %v644_v8  ;;  %v705_v11 = vsel %vm673_vm13, %v635_v2, %v689_v5 }
 0x100   : > { %vm676_vm14 = vcmp.ge.f32.partialorder %v650_v7, 0.0  ;;  %v692_v12 = vmul.f32 0.1, %v650_v7  ;;  %2351 = vmatprep.mubr.msk.f32.mxu1 %vm719_vm3, %v705_v11 }
 0x101   : > { %vm675_vm15 = vcmp.ge.f32.partialorder %v645_v10, 0.0  ;;  %v691_v13 = vmul.f32 0.1, %v645_v10  ;;  %v2333_v14 = vpop.f32.mrb[14].mxu0  ;;  %2352 = vmatmul.mubr.msk.f32.gmra.mrb[10].mxu1 %vm719_vm3, %v706_v9 }
 0x102   : > { %v660_v15 = vadd.f32 %v2333_v14, %v2752_v23  ;;  %v654_v16 = vpop.f32.mrb[15].mxu0  ;;  %v708_v17 = vsel %vm676_vm14, %v650_v7, %v692_v12  ;;  %v1397_v12 = vld [vmem:[%s3074_s9] sm:$0xff]  ;;  %v1399_v14 = vld [vmem:[%s3074_s9 + $0x10] sm:$0xff] }
 0x103   : > { %v655_v18 = vadd.f32 %v2752_v23, %v654_v16  ;;  %v707_v19 = vsel %vm675_vm15, %v645_v10, %v691_v13  ;;  %v1180_v23 = vld [vmem:[%s3072_s7 + $0x8] sm:$0xff]  ;;  %v1400_v16 = vld [vmem:[%s3074_s9 + $0x18] sm:$0xff] }
 0x104   : > { %vm678_vm1 = vcmp.ge.f32.partialorder %v660_v15, 0.0  ;;  %v694_v20 = vmul.f32 0.1, %v660_v15  ;;  %2354 = vmatprep.mubr.msk.f32.mxu1 %vm719_vm3, %v707_v19  ;;  %v2484_v26 = vpack.c.bf16 %v1180_v23, %v1179_v25  ;;  %v1398_v13 = vld [vmem:[%s3074_s9 + $0x8] sm:$0xff] }
 0x105   : > { %vm677_vm2 = vcmp.ge.f32.partialorder %v655_v18, 0.0  ;;  %v693_v21 = vmul.f32 0.1, %v655_v18  ;;  %2355 = vmatmul.mubr.msk.f32.gmra.mrb[12].mxu1 %vm719_vm3, %v708_v17  ;;  %v2492_v17 = vpack.c.bf16 %v1400_v16, %v1399_v14 }
 0x106   : > { %v710_v22 = vsel %vm678_vm1, %v660_v15, %v694_v20  ;;  %2485 = vmatprep.subr.bf16.mxu0 %v2484_v26  ;;  %v2488_v15 = vpack.c.bf16 %v1398_v13, %v1397_v12 }
 0x107   : > { %v709_v24 = vsel %vm677_vm2, %v655_v18, %v693_v21  ;;  %2487 = vmatpush3.bf16.msra.mxu0 %v2484_v26  ;;  %v2844_v18 = vld [vmem:[%s3071_s6] ss:$0 sm:$0xff] }
 0x108   : > { %2357 = vmatprep.mubr.msk.f32.mxu1 %vm719_vm3, %v709_v24  ;;  %2489 = vmatprep.subr.bf16.mxu1 %v2488_v15 }
 0x109   : > { %2358 = vmatmul.mubr.msk.f32.gmra.mrb[14].mxu1 %vm719_vm3, %v710_v22 }
 0x1c0   : > { %v2338_v28 = vpop.f32.mrb[0].mxu1 }
 0x1c1   : > { %v840_v29 = vadd.f32 %v2338_v28, %v2795_v27  ;;  %v834_v30 = vpop.f32.mrb[1].mxu1 }
 0x1c2   : > { %v835_v31 = vadd.f32 %v2795_v27, %v834_v30 }
 0x1c4   : > { %2509 = vtanh.f32 %v835_v31  ;;  %v2341_v32 = vpop.f32.mrb[2].mxu1 }
 0x1c5   : > { %2511 = vtanh.f32 %v840_v29  ;;  %v850_v33 = vadd.f32 %v2341_v32, %v2795_v27  ;;  %v844_v34 = vpop.f32.mrb[3].mxu1 }
 0x1c6   : > { %v845_v35 = vadd.f32 %v2795_v27, %v844_v34 }
 0x1c8   : > { %2513 = vtanh.f32 %v845_v35  ;;  %v2344_v36 = vpop.f32.mrb[4].mxu1 }
 0x1c9   : > { %2515 = vtanh.f32 %v850_v33  ;;  %v860_v37 = vadd.f32 %v2344_v36, %v2795_v27  ;;  %v854_v38 = vpop.f32.mrb[5].mxu1 }
 0x1ca   : > { %v855_v39 = vadd.f32 %v2795_v27, %v854_v38 }
 0x1cc   : > { %2517 = vtanh.f32 %v855_v39  ;;  %v2347_v40 = vpop.f32.mrb[6].mxu1 }
 0x1cd   : > { %2519 = vtanh.f32 %v860_v37  ;;  %v870_v41 = vadd.f32 %v2347_v40, %v2795_v27  ;;  %v864_v42 = vpop.f32.mrb[7].mxu1 }
 0x1ce   : > { %v2510_v43 = vpop.eup %2509  ;;  %v865_v44 = vadd.f32 %v2795_v27, %v864_v42 }
 0x1cf   : > { %v2512_v45 = vpop.eup %2511  ;;  %2364 = vmatprep.mubr.msk.f32.mxu1 %vm469_vm0, %v2510_v43 }
 0x1d0   : > { %2521 = vtanh.f32 %v865_v44  ;;  %v2350_v46 = vpop.f32.mrb[8].mxu1  ;;  %2365 = vmatmul.mubr.msk.f32.vlgmr.msra.gmra.mrb[16].mxu1 %vm469_vm0, %v2512_v45 }
 0x1d1   : > { %2523 = vtanh.f32 %v870_v41  ;;  %v880_v47 = vadd.f32 %v2350_v46, %v2795_v27  ;;  %v874_v48 = vpop.f32.mrb[9].mxu1  ;;  %2491 = vmatpush3.bf16.msra.mxu1 %v2488_v15 }
 0x1d2   : > { %v2514_v49 = vpop.eup %2513  ;;  %v875_v50 = vadd.f32 %v2795_v27, %v874_v48  ;;  %2493 = vmatprep.subr.bf16.mxu1 %v2492_v17 }
 0x1d3   : > { %v2516_v51 = vpop.eup %2515  ;;  %2367 = vmatprep.mubr.msk.f32.mxu1 %vm469_vm0, %v2514_v49 }
 0x1d4   : > { %2525 = vtanh.f32 %v875_v50  ;;  %v2353_v52 = vpop.f32.mrb[10].mxu1  ;;  %2368 = vmatmul.mubr.msk.f32.gmra.mrb[18].mxu1 %vm469_vm0, %v2516_v51 }
 0x1d5   : > { %2527 = vtanh.f32 %v880_v47  ;;  %v890_v53 = vadd.f32 %v2353_v52, %v2795_v27  ;;  %v884_v54 = vpop.f32.mrb[11].mxu1  ;;  %2495 = vmatpush3.bf16.msra.mxu1 %v2492_v17 }
 0x1d6   : > { %v2518_v55 = vpop.eup %2517  ;;  %v885_v56 = vadd.f32 %v2795_v27, %v884_v54 }
 0x1d7   : > { %v2520_v57 = vpop.eup %2519  ;;  %2370 = vmatprep.mubr.msk.f32.mxu1 %vm469_vm0, %v2518_v55 }
 0x1d8   : > { %2529 = vtanh.f32 %v885_v56  ;;  %v2356_v58 = vpop.f32.mrb[12].mxu1  ;;  %2371 = vmatmul.mubr.msk.f32.gmra.mrb[20].mxu1 %vm469_vm0, %v2520_v57 }
 0x1d9   : > { %2531 = vtanh.f32 %v890_v53  ;;  %v900_v59 = vadd.f32 %v2356_v58, %v2795_v27  ;;  %v894_v60 = vpop.f32.mrb[13].mxu1 }
 0x1da   : > { %v2522_v61 = vpop.eup %2521  ;;  %v895_v62 = vadd.f32 %v2795_v27, %v894_v60 }
 0x1db   : > { %v2524_v63 = vpop.eup %2523  ;;  %2373 = vmatprep.mubr.msk.f32.mxu1 %vm469_vm0, %v2522_v61 }
 0x1dc   : > { %2533 = vtanh.f32 %v895_v62  ;;  %v2359_v0 = vpop.f32.mrb[14].mxu1  ;;  %2374 = vmatmul.mubr.msk.f32.gmra.mrb[22].mxu1 %vm469_vm0, %v2524_v63 }
 0x1dd   : > { %2535 = vtanh.f32 %v900_v59  ;;  %v910_v1 = vadd.f32 %v2359_v0, %v2795_v27  ;;  %v904_v2 = vpop.f32.mrb[15].mxu1 }
 0x1de   : > { %v2526_v3 = vpop.eup %2525  ;;  %v905_v4 = vadd.f32 %v2795_v27, %v904_v2 }
 0x1df   : > { %v2528_v5 = vpop.eup %2527  ;;  %2376 = vmatprep.mubr.msk.f32.mxu1 %vm469_vm0, %v2526_v3 }
 0x1e0   : > { %2537 = vtanh.f32 %v905_v4  ;;  %2377 = vmatmul.mubr.msk.f32.gmra.mrb[24].mxu1 %vm469_vm0, %v2528_v5 }
 0x1e1   : > { %2539 = vtanh.f32 %v910_v1 }
 0x1e2   : > { %v2530_v6 = vpop.eup %2529 }
 0x1e3   : > { %v2532_v7 = vpop.eup %2531  ;;  %2379 = vmatprep.mubr.msk.f32.mxu1 %vm469_vm0, %v2530_v6 }
 0x1e4   : > { %2380 = vmatmul.mubr.msk.f32.gmra.mrb[26].mxu1 %vm469_vm0, %v2532_v7 }
 0x1e6   : > { %v2534_v8 = vpop.eup %2533 }
 0x1e7   : > { %v2536_v9 = vpop.eup %2535  ;;  %2382 = vmatprep.mubr.msk.f32.mxu1 %vm469_vm0, %v2534_v8 }
 0x1e8   : > { %2383 = vmatmul.mubr.msk.f32.gmra.mrb[28].mxu1 %vm469_vm0, %v2536_v9 }
 0x1ea   : > { %v2538_v10 = vpop.eup %2537 }
 0x1eb   : > { %v2540_v11 = vpop.eup %2539  ;;  %2385 = vmatprep.mubr.msk.f32.mxu1 %vm469_vm0, %v2538_v10 }
 0x1ec   : > { %2386 = vmatmul.mubr.msk.f32.gmra.mrb[30].mxu1 %vm469_vm0, %v2540_v11 }
 0x2a3   : > { %v2366_v19 = vpop.f32.mrb[16].mxu1 }
 0x2a4   : > { %v1058_v20 = vadd.f32 %v2366_v19, %v2844_v18  ;;  %v1052_v21 = vpop.f32.mrb[17].mxu1 }
 0x2a5   : > { %v1053_v22 = vadd.f32 %v2844_v18, %v1052_v21 }
 0x2a6   : > { %v1148_v24 = vmul.f32 0.1, %v1058_v20  ;;  %vm1132_vm3 = vcmp.ge.f32.partialorder %v1058_v20, 0.0 }
 0x2a7   : > { %vm1131_vm4 = vcmp.ge.f32.partialorder %v1053_v22, 0.0  ;;  %v1147_v25 = vmul.f32 0.1, %v1053_v22  ;;  %v2369_v23 = vpop.f32.mrb[18].mxu1 }
 0x2a8   : > { %v1068_v26 = vadd.f32 %v2369_v23, %v2844_v18  ;;  %v1062_v27 = vpop.f32.mrb[19].mxu1  ;;  %v1164_v30 = vsel %vm1132_vm3, %v1058_v20, %v1148_v24  ;;  %v1651_v20 = vld [vmem:[%s3076_s11 + $0x8] sm:$0xff] }
 0x2a9   : > { %v1063_v28 = vadd.f32 %v2844_v18, %v1062_v27  ;;  %v1163_v29 = vsel %vm1131_vm4, %v1053_v22, %v1147_v25  ;;  %v2887_v22 = vld [vmem:[%s3073_s8] ss:$0 sm:$0xff]  ;;  %vm1408_vm4 = vcmask 261120  }
 0x2aa   : > { %v1150_v31 = vmul.f32 0.1, %v1068_v26  ;;  %2392 = vmatprep.mubr.msk.f32.mxu0 %vm469_vm0, %v1163_v29  ;;  %vm1134_vm5 = vcmp.ge.f32.partialorder %v1068_v26, 0.0 }
 0x2ab   : > { %vm1133_vm6 = vcmp.ge.f32.partialorder %v1063_v28, 0.0  ;;  %v1149_v32 = vmul.f32 0.1, %v1063_v28  ;;  %v2372_v33 = vpop.f32.mrb[20].mxu1  ;;  %2393 = vmatmul.mubr.msk.f32.vlgmr.msra.gmra.mrb[16].mxu0 %vm469_vm0, %v1164_v30 }
 0x2ac   : > { %v1078_v34 = vadd.f32 %v2372_v33, %v2844_v18  ;;  %v1072_v35 = vpop.f32.mrb[21].mxu1  ;;  %v1166_v39 = vsel %vm1134_vm5, %v1068_v26, %v1150_v31 }
 0x2ad   : > { %v1073_v36 = vadd.f32 %v2844_v18, %v1072_v35  ;;  %v1165_v37 = vsel %vm1133_vm6, %v1063_v28, %v1149_v32 }
 0x2ae   : > { %v1152_v38 = vmul.f32 0.1, %v1078_v34  ;;  %2395 = vmatprep.mubr.msk.f32.mxu0 %vm469_vm0, %v1165_v37  ;;  %vm1136_vm7 = vcmp.ge.f32.partialorder %v1078_v34, 0.0 }
 0x2af   : > { %vm1135_vm8 = vcmp.ge.f32.partialorder %v1073_v36, 0.0  ;;  %v1151_v40 = vmul.f32 0.1, %v1073_v36  ;;  %v2375_v41 = vpop.f32.mrb[22].mxu1  ;;  %2396 = vmatmul.mubr.msk.f32.gmra.mrb[18].mxu0 %vm469_vm0, %v1166_v39 }
 0x2b0   : > { %v1088_v42 = vadd.f32 %v2375_v41, %v2844_v18  ;;  %v1082_v43 = vpop.f32.mrb[23].mxu1  ;;  %v1168_v47 = vsel %vm1136_vm7, %v1078_v34, %v1152_v38 }
 0x2b1   : > { %v1083_v44 = vadd.f32 %v2844_v18, %v1082_v43  ;;  %v1167_v45 = vsel %vm1135_vm8, %v1073_v36, %v1151_v40 }
 0x2b2   : > { %v1154_v46 = vmul.f32 0.1, %v1088_v42  ;;  %2398 = vmatprep.mubr.msk.f32.mxu0 %vm469_vm0, %v1167_v45  ;;  %vm1138_vm9 = vcmp.ge.f32.partialorder %v1088_v42, 0.0 }
 0x2b3   : > { %vm1137_vm10 = vcmp.ge.f32.partialorder %v1083_v44, 0.0  ;;  %v1153_v48 = vmul.f32 0.1, %v1083_v44  ;;  %v2378_v49 = vpop.f32.mrb[24].mxu1  ;;  %2399 = vmatmul.mubr.msk.f32.gmra.mrb[20].mxu0 %vm469_vm0, %v1168_v47 }
 0x2b4   : > { %v1098_v50 = vadd.f32 %v2378_v49, %v2844_v18  ;;  %v1092_v51 = vpop.f32.mrb[25].mxu1  ;;  %v1170_v55 = vsel %vm1138_vm9, %v1088_v42, %v1154_v46 }
 0x2b5   : > { %v1093_v52 = vadd.f32 %v2844_v18, %v1092_v51  ;;  %v1169_v53 = vsel %vm1137_vm10, %v1083_v44, %v1153_v48 }
 0x2b6   : > { %v1156_v54 = vmul.f32 0.1, %v1098_v50  ;;  %2401 = vmatprep.mubr.msk.f32.mxu0 %vm469_vm0, %v1169_v53  ;;  %vm1140_vm11 = vcmp.ge.f32.partialorder %v1098_v50, 0.0 }
 0x2b7   : > { %vm1139_vm12 = vcmp.ge.f32.partialorder %v1093_v52, 0.0  ;;  %v1155_v56 = vmul.f32 0.1, %v1093_v52  ;;  %v2381_v57 = vpop.f32.mrb[26].mxu1  ;;  %2402 = vmatmul.mubr.msk.f32.gmra.mrb[22].mxu0 %vm469_vm0, %v1170_v55 }
 0x2b8   : > { %v1108_v58 = vadd.f32 %v2381_v57, %v2844_v18  ;;  %v1102_v59 = vpop.f32.mrb[27].mxu1  ;;  %v1172_v63 = vsel %vm1140_vm11, %v1098_v50, %v1156_v54 }
 0x2b9   : > { %v1103_v60 = vadd.f32 %v2844_v18, %v1102_v59  ;;  %v1171_v61 = vsel %vm1139_vm12, %v1093_v52, %v1155_v56 }
 0x2ba   : > { %v1158_v62 = vmul.f32 0.1, %v1108_v58  ;;  %2404 = vmatprep.mubr.msk.f32.mxu0 %vm469_vm0, %v1171_v61  ;;  %vm1142_vm13 = vcmp.ge.f32.partialorder %v1108_v58, 0.0 }
 0x2bb   : > { %vm1141_vm14 = vcmp.ge.f32.partialorder %v1103_v60, 0.0  ;;  %v1157_v0 = vmul.f32 0.1, %v1103_v60  ;;  %v2384_v1 = vpop.f32.mrb[28].mxu1  ;;  %2405 = vmatmul.mubr.msk.f32.gmra.mrb[24].mxu0 %vm469_vm0, %v1172_v63 }
 0x2bc   : > { %v1118_v2 = vadd.f32 %v2384_v1, %v2844_v18  ;;  %v1112_v3 = vpop.f32.mrb[29].mxu1  ;;  %v1174_v7 = vsel %vm1142_vm13, %v1108_v58, %v1158_v62 }
 0x2bd   : > { %v1113_v4 = vadd.f32 %v2844_v18, %v1112_v3  ;;  %v1173_v5 = vsel %vm1141_vm14, %v1103_v60, %v1157_v0 }
 0x2be   : > { %v1160_v6 = vmul.f32 0.1, %v1118_v2  ;;  %2407 = vmatprep.mubr.msk.f32.mxu0 %vm469_vm0, %v1173_v5  ;;  %vm1144_vm15 = vcmp.ge.f32.partialorder %v1118_v2, 0.0 }
 0x2bf   : > { %vm1143_vm1 = vcmp.ge.f32.partialorder %v1113_v4, 0.0  ;;  %v1159_v8 = vmul.f32 0.1, %v1113_v4  ;;  %v2387_v9 = vpop.f32.mrb[30].mxu1  ;;  %2408 = vmatmul.mubr.msk.f32.gmra.mrb[26].mxu0 %vm469_vm0, %v1174_v7  ;;  %v2924_v7 = vld [vmem:[%s3075_s10] ss:$0 sm:$0xff] }
 0x2c0   : > { %v1128_v10 = vadd.f32 %v2387_v9, %v2844_v18  ;;  %v1122_v11 = vpop.f32.mrb[31].mxu1  ;;  %v1176_v15 = vsel %vm1144_vm15, %v1118_v2, %v1160_v6 }
 0x2c1   : > { %v1123_v12 = vadd.f32 %v2844_v18, %v1122_v11  ;;  %v1175_v13 = vsel %vm1143_vm1, %v1113_v4, %v1159_v8  ;;  %v1650_v18 = vld [vmem:[%s3076_s11] sm:$0xff] }
 0x2c2   : > { %v1162_v14 = vmul.f32 0.1, %v1128_v10  ;;  %2410 = vmatprep.mubr.msk.f32.mxu0 %vm469_vm0, %v1175_v13  ;;  %vm1146_vm2 = vcmp.ge.f32.partialorder %v1128_v10, 0.0  ;;  %v2496_v21 = vpack.c.bf16 %v1651_v20, %v1650_v18 }
 0x2c3   : > { %vm1145_vm3 = vcmp.ge.f32.partialorder %v1123_v12, 0.0  ;;  %v1161_v16 = vmul.f32 0.1, %v1123_v12  ;;  %2411 = vmatmul.mubr.msk.f32.gmra.mrb[28].mxu0 %vm469_vm0, %v1176_v15 }
 0x2c4   : > { %v1178_v19 = vsel %vm1146_vm2, %v1128_v10, %v1162_v14  ;;  %2497 = vmatprep.subr.bf16.mxu0 %v2496_v21 }
 0x2c5   : > { %v1177_v17 = vsel %vm1145_vm3, %v1123_v12, %v1161_v16  ;;  %2499 = vmatpush3.bf16.msra.mxu0 %v2496_v21 }
 0x2c6   : > { %2413 = vmatprep.mubr.msk.f32.mxu0 %vm469_vm0, %v1177_v17 }
 0x2c7   : > { %2414 = vmatmul.mubr.msk.f32.gmra.mrb[30].mxu0 %vm469_vm0, %v1178_v19 }
 0x37e   : > { %v2394_v24 = vpop.f32.mrb[16].mxu0 }
 0x37f   : > { %v1308_v25 = vadd.f32 %v2394_v24, %v2887_v22  ;;  %v1302_v23 = vpop.f32.mrb[17].mxu0 }
 0x380   : > { %v1303_v26 = vadd.f32 %v2887_v22, %v1302_v23 }
 0x382   : > { %2541 = vtanh.f32 %v1303_v26  ;;  %v2397_v27 = vpop.f32.mrb[18].mxu0 }
 0x383   : > { %2543 = vtanh.f32 %v1308_v25  ;;  %v1318_v28 = vadd.f32 %v2397_v27, %v2887_v22  ;;  %v1312_v29 = vpop.f32.mrb[19].mxu0 }
 0x384   : > { %v1313_v30 = vadd.f32 %v2887_v22, %v1312_v29 }
 0x386   : > { %2545 = vtanh.f32 %v1313_v30  ;;  %v2400_v31 = vpop.f32.mrb[20].mxu0 }
 0x387   : > { %2547 = vtanh.f32 %v1318_v28  ;;  %v1328_v32 = vadd.f32 %v2400_v31, %v2887_v22  ;;  %v1322_v33 = vpop.f32.mrb[21].mxu0 }
 0x388   : > { %v1323_v34 = vadd.f32 %v2887_v22, %v1322_v33 }
 0x38a   : > { %2549 = vtanh.f32 %v1323_v34  ;;  %v2403_v35 = vpop.f32.mrb[22].mxu0 }
 0x38b   : > { %2551 = vtanh.f32 %v1328_v32  ;;  %v1338_v36 = vadd.f32 %v2403_v35, %v2887_v22  ;;  %v1332_v37 = vpop.f32.mrb[23].mxu0 }
 0x38c   : > { %v2542_v38 = vpop.eup %2541  ;;  %v1333_v39 = vadd.f32 %v2887_v22, %v1332_v37 }
 0x38d   : > { %v2544_v40 = vpop.eup %2543  ;;  %2424 = vmatprep.mubr.msk.f32.mxu1 %vm1408_vm4, %v2542_v38 }
 0x38e   : > { %2553 = vtanh.f32 %v1333_v39  ;;  %v2406_v41 = vpop.f32.mrb[24].mxu0  ;;  %2425 = vmatmul.mubr.msk.f32.vlgmr.msra.gmra.mrb[32].mxu1 %vm1408_vm4, %v2544_v40 }
 0x38f   : > { %2555 = vtanh.f32 %v1338_v36  ;;  %v1348_v42 = vadd.f32 %v2406_v41, %v2887_v22  ;;  %v1342_v43 = vpop.f32.mrb[25].mxu0 }
 0x390   : > { %v2546_v44 = vpop.eup %2545  ;;  %v1343_v45 = vadd.f32 %v2887_v22, %v1342_v43 }
 0x391   : > { %v2548_v46 = vpop.eup %2547  ;;  %2427 = vmatprep.mubr.msk.f32.mxu1 %vm1408_vm4, %v2546_v44 }
 0x392   : > { %2557 = vtanh.f32 %v1343_v45  ;;  %v2409_v47 = vpop.f32.mrb[26].mxu0  ;;  %2428 = vmatmul.mubr.msk.f32.gmra.mrb[34].mxu1 %vm1408_vm4, %v2548_v46 }
 0x393   : > { %2559 = vtanh.f32 %v1348_v42  ;;  %v1358_v48 = vadd.f32 %v2409_v47, %v2887_v22  ;;  %v1352_v49 = vpop.f32.mrb[27].mxu0 }
 0x394   : > { %v2550_v50 = vpop.eup %2549  ;;  %v1353_v51 = vadd.f32 %v2887_v22, %v1352_v49 }
 0x395   : > { %v2552_v52 = vpop.eup %2551  ;;  %2430 = vmatprep.mubr.msk.f32.mxu1 %vm1408_vm4, %v2550_v50 }
 0x396   : > { %2561 = vtanh.f32 %v1353_v51  ;;  %v2412_v53 = vpop.f32.mrb[28].mxu0  ;;  %2431 = vmatmul.mubr.msk.f32.gmra.mrb[36].mxu1 %vm1408_vm4, %v2552_v52 }
 0x397   : > { %2563 = vtanh.f32 %v1358_v48  ;;  %v1368_v54 = vadd.f32 %v2412_v53, %v2887_v22  ;;  %v1362_v55 = vpop.f32.mrb[29].mxu0 }
 0x398   : > { %v2554_v56 = vpop.eup %2553  ;;  %v1363_v57 = vadd.f32 %v2887_v22, %v1362_v55 }
 0x399   : > { %v2556_v58 = vpop.eup %2555  ;;  %2433 = vmatprep.mubr.msk.f32.mxu1 %vm1408_vm4, %v2554_v56 }
 0x39a   : > { %2565 = vtanh.f32 %v1363_v57  ;;  %v2415_v59 = vpop.f32.mrb[30].mxu0  ;;  %2434 = vmatmul.mubr.msk.f32.gmra.mrb[38].mxu1 %vm1408_vm4, %v2556_v58 }
 0x39b   : > { %2567 = vtanh.f32 %v1368_v54  ;;  %v1378_v60 = vadd.f32 %v2415_v59, %v2887_v22  ;;  %v1372_v61 = vpop.f32.mrb[31].mxu0 }
 0x39c   : > { %v2558_v62 = vpop.eup %2557  ;;  %v1373_v63 = vadd.f32 %v2887_v22, %v1372_v61 }
 0x39d   : > { %v2560_v0 = vpop.eup %2559  ;;  %2436 = vmatprep.mubr.msk.f32.mxu1 %vm1408_vm4, %v2558_v62 }
 0x39e   : > { %2569 = vtanh.f32 %v1373_v63  ;;  %2437 = vmatmul.mubr.msk.f32.gmra.mrb[40].mxu1 %vm1408_vm4, %v2560_v0 }
 0x39f   : > { %2571 = vtanh.f32 %v1378_v60 }
 0x3a0   : > { %v2562_v1 = vpop.eup %2561 }
 0x3a1   : > { %v2564_v2 = vpop.eup %2563  ;;  %2439 = vmatprep.mubr.msk.f32.mxu1 %vm1408_vm4, %v2562_v1 }
 0x3a2   : > { %2440 = vmatmul.mubr.msk.f32.gmra.mrb[42].mxu1 %vm1408_vm4, %v2564_v2 }
 0x3a4   : > { %v2566_v3 = vpop.eup %2565 }
 0x3a5   : > { %v2568_v4 = vpop.eup %2567  ;;  %2442 = vmatprep.mubr.msk.f32.mxu1 %vm1408_vm4, %v2566_v3 }
 0x3a6   : > { %2443 = vmatmul.mubr.msk.f32.gmra.mrb[44].mxu1 %vm1408_vm4, %v2568_v4 }
 0x3a8   : > { %v2570_v5 = vpop.eup %2569 }
 0x3a9   : > { %v2572_v6 = vpop.eup %2571  ;;  %2445 = vmatprep.mubr.msk.f32.mxu1 %vm1408_vm4, %v2570_v5 }
 0x3aa   : > { %2446 = vmatmul.mubr.msk.f32.gmra.mrb[46].mxu1 %vm1408_vm4, %v2572_v6 }
 0x461   : > { %v2426_v8 = vpop.f32.mrb[32].mxu1 }
 0x462   : > { %v1529_v9 = vadd.f32 %v2426_v8, %v2924_v7  ;;  %v1523_v10 = vpop.f32.mrb[33].mxu1 }
 0x463   : > { %v1524_v11 = vadd.f32 %v2924_v7, %v1523_v10 }
 0x464   : > { %v1619_v12 = vmul.f32 0.1, %v1529_v9  ;;  %vm1603_vm5 = vcmp.ge.f32.partialorder %v1529_v9, 0.0 }
 0x465   : > { %vm1602_vm6 = vcmp.ge.f32.partialorder %v1524_v11, 0.0  ;;  %v1618_v13 = vmul.f32 0.1, %v1524_v11  ;;  %v2429_v14 = vpop.f32.mrb[34].mxu1 }
 0x466   : > { %v1539_v15 = vadd.f32 %v2429_v14, %v2924_v7  ;;  %v1533_v16 = vpop.f32.mrb[35].mxu1  ;;  %v1635_v18 = vsel %vm1603_vm5, %v1529_v9, %v1619_v12 }
 0x467   : > { %v1534_v17 = vadd.f32 %v2924_v7, %v1533_v16  ;;  %v1634_v19 = vsel %vm1602_vm6, %v1524_v11, %v1618_v13 }
 0x468   : > { %v1621_v20 = vmul.f32 0.1, %v1539_v15  ;;  %2452 = vmatprep.mubr.msk.f32.mxu0 %vm469_vm0, %v1634_v19  ;;  %vm1605_vm7 = vcmp.ge.f32.partialorder %v1539_v15, 0.0 }
 0x469   : > { %vm1604_vm8 = vcmp.ge.f32.partialorder %v1534_v17, 0.0  ;;  %v1620_v21 = vmul.f32 0.1, %v1534_v17  ;;  %v2432_v22 = vpop.f32.mrb[36].mxu1  ;;  %2453 = vmatmul.mubr.msk.f32.vlgmr.msra.gmra.mrb[32].mxu0 %vm469_vm0, %v1635_v18 }
 0x46a   : > { %v1549_v24 = vadd.f32 %v2432_v22, %v2924_v7  ;;  %v1543_v25 = vpop.f32.mrb[37].mxu1  ;;  %v1637_v28 = vsel %vm1605_vm7, %v1539_v15, %v1621_v20 }
 0x46b   : > { %v1544_v23 = vadd.f32 %v2924_v7, %v1543_v25  ;;  %v1636_v26 = vsel %vm1604_vm8, %v1534_v17, %v1620_v21 }
 0x46c   : > { %v1623_v27 = vmul.f32 0.1, %v1549_v24  ;;  %2455 = vmatprep.mubr.msk.f32.mxu0 %vm469_vm0, %v1636_v26  ;;  %vm1607_vm9 = vcmp.ge.f32.partialorder %v1549_v24, 0.0 }
 0x46d   : > { %vm1606_vm10 = vcmp.ge.f32.partialorder %v1544_v23, 0.0  ;;  %v1622_v29 = vmul.f32 0.1, %v1544_v23  ;;  %v2435_v30 = vpop.f32.mrb[38].mxu1  ;;  %2456 = vmatmul.mubr.msk.f32.gmra.mrb[34].mxu0 %vm469_vm0, %v1637_v28 }
 0x46e   : > { %v1559_v31 = vadd.f32 %v2435_v30, %v2924_v7  ;;  %v1553_v32 = vpop.f32.mrb[39].mxu1  ;;  %v1639_v36 = vsel %vm1607_vm9, %v1549_v24, %v1623_v27 }
 0x46f   : > { %v1554_v33 = vadd.f32 %v2924_v7, %v1553_v32  ;;  %v1638_v34 = vsel %vm1606_vm10, %v1544_v23, %v1622_v29 }
 0x470   : > { %v1625_v35 = vmul.f32 0.1, %v1559_v31  ;;  %2458 = vmatprep.mubr.msk.f32.mxu0 %vm469_vm0, %v1638_v34  ;;  %vm1609_vm11 = vcmp.ge.f32.partialorder %v1559_v31, 0.0 }
 0x471   : > { %vm1608_vm12 = vcmp.ge.f32.partialorder %v1554_v33, 0.0  ;;  %v1624_v37 = vmul.f32 0.1, %v1554_v33  ;;  %v2438_v38 = vpop.f32.mrb[40].mxu1  ;;  %2459 = vmatmul.mubr.msk.f32.gmra.mrb[36].mxu0 %vm469_vm0, %v1639_v36 }
 0x472   : > { %v1569_v39 = vadd.f32 %v2438_v38, %v2924_v7  ;;  %v1563_v40 = vpop.f32.mrb[41].mxu1  ;;  %v1641_v44 = vsel %vm1609_vm11, %v1559_v31, %v1625_v35 }
 0x473   : > { %v1564_v41 = vadd.f32 %v2924_v7, %v1563_v40  ;;  %v1640_v42 = vsel %vm1608_vm12, %v1554_v33, %v1624_v37 }
 0x474   : > { %v1627_v43 = vmul.f32 0.1, %v1569_v39  ;;  %2461 = vmatprep.mubr.msk.f32.mxu0 %vm469_vm0, %v1640_v42  ;;  %vm1611_vm13 = vcmp.ge.f32.partialorder %v1569_v39, 0.0 }
 0x475   : > { %vm1610_vm14 = vcmp.ge.f32.partialorder %v1564_v41, 0.0  ;;  %v1626_v45 = vmul.f32 0.1, %v1564_v41  ;;  %v2441_v46 = vpop.f32.mrb[42].mxu1  ;;  %2462 = vmatmul.mubr.msk.f32.gmra.mrb[38].mxu0 %vm469_vm0, %v1641_v44 }
 0x476   : > { %v1579_v47 = vadd.f32 %v2441_v46, %v2924_v7  ;;  %v1573_v48 = vpop.f32.mrb[43].mxu1  ;;  %v1643_v52 = vsel %vm1611_vm13, %v1569_v39, %v1627_v43 }
 0x477   : > { %v1574_v49 = vadd.f32 %v2924_v7, %v1573_v48  ;;  %v1642_v50 = vsel %vm1610_vm14, %v1564_v41, %v1626_v45 }
 0x478   : > { %v1629_v51 = vmul.f32 0.1, %v1579_v47  ;;  %2464 = vmatprep.mubr.msk.f32.mxu0 %vm469_vm0, %v1642_v50  ;;  %vm1613_vm15 = vcmp.ge.f32.partialorder %v1579_v47, 0.0 }
 0x479   : > { %vm1612_vm1 = vcmp.ge.f32.partialorder %v1574_v49, 0.0  ;;  %v1628_v53 = vmul.f32 0.1, %v1574_v49  ;;  %v2444_v54 = vpop.f32.mrb[44].mxu1  ;;  %2465 = vmatmul.mubr.msk.f32.gmra.mrb[40].mxu0 %vm469_vm0, %v1643_v52 }
 0x47a   : > { %v1589_v55 = vadd.f32 %v2444_v54, %v2924_v7  ;;  %v1583_v56 = vpop.f32.mrb[45].mxu1  ;;  %v1645_v60 = vsel %vm1613_vm15, %v1579_v47, %v1629_v51 }
 0x47b   : > { %v1584_v57 = vadd.f32 %v2924_v7, %v1583_v56  ;;  %v1644_v58 = vsel %vm1612_vm1, %v1574_v49, %v1628_v53 }
 0x47c   : > { %v1631_v59 = vmul.f32 0.1, %v1589_v55  ;;  %2467 = vmatprep.mubr.msk.f32.mxu0 %vm469_vm0, %v1644_v58  ;;  %vm1615_vm2 = vcmp.ge.f32.partialorder %v1589_v55, 0.0 }
 0x47d   : > { %vm1614_vm3 = vcmp.ge.f32.partialorder %v1584_v57, 0.0  ;;  %v1630_v61 = vmul.f32 0.1, %v1584_v57  ;;  %v2447_v62 = vpop.f32.mrb[46].mxu1  ;;  %2468 = vmatmul.mubr.msk.f32.gmra.mrb[42].mxu0 %vm469_vm0, %v1645_v60 }
 0x47e   : > { %v1599_v63 = vadd.f32 %v2447_v62, %v2924_v7  ;;  %v1593_v0 = vpop.f32.mrb[47].mxu1  ;;  %v1647_v4 = vsel %vm1615_vm2, %v1589_v55, %v1631_v59 }
 0x47f   : > { %v1594_v1 = vadd.f32 %v2924_v7, %v1593_v0  ;;  %v1646_v2 = vsel %vm1614_vm3, %v1584_v57, %v1630_v61  ;;  %v2961_v7 = vld [vmem:[%s3077_s12] ss:$0 sm:$0xff] }
 0x480   : > { %v1633_v3 = vmul.f32 0.1, %v1599_v63  ;;  %2470 = vmatprep.mubr.msk.f32.mxu0 %vm469_vm0, %v1646_v2  ;;  %vm1617_vm4 = vcmp.ge.f32.partialorder %v1599_v63, 0.0 }
 0x481   : > { %vm1616_vm5 = vcmp.ge.f32.partialorder %v1594_v1, 0.0  ;;  %v1632_v5 = vmul.f32 0.1, %v1594_v1  ;;  %2471 = vmatmul.mubr.msk.f32.gmra.mrb[44].mxu0 %vm469_vm0, %v1647_v4 }
 0x482   : > { %v1649_v8 = vsel %vm1617_vm4, %v1599_v63, %v1633_v3 }
 0x483   : > { %v1648_v6 = vsel %vm1616_vm5, %v1594_v1, %v1632_v5 }
 0x484   : > { %2473 = vmatprep.mubr.msk.f32.mxu0 %vm469_vm0, %v1648_v6 }
 0x485   : > { %2474 = vmatmul.mubr.msk.f32.gmra.mrb[46].mxu0 %vm469_vm0, %v1649_v8 }
 0x53c   : > { %v2454_v9 = vpop.f32.mrb[32].mxu0 }
 0x53d   : > { %v1779_v10 = vadd.f32 %v2454_v9, %v2961_v7  ;;  %v1773_v11 = vpop.f32.mrb[33].mxu0 }
 0x53e   : > { %v1774_v12 = vadd.f32 %v2961_v7, %v1773_v11 }
 0x53f   : > { %2573 = vtanh.f32 %v1779_v10 }
 0x540   : > { %v2457_v13 = vpop.f32.mrb[34].mxu0  ;;  %2575 = vtanh.f32 %v1774_v12 }
 0x541   : > { %v1789_v14 = vadd.f32 %v2457_v13, %v2961_v7  ;;  %v1783_v15 = vpop.f32.mrb[35].mxu0 }
 0x542   : > { %v1784_v16 = vadd.f32 %v2961_v7, %v1783_v15 }
 0x543   : > { %2577 = vtanh.f32 %v1789_v14 }
 0x544   : > { %v2460_v17 = vpop.f32.mrb[36].mxu0  ;;  %2579 = vtanh.f32 %v1784_v16 }
 0x545   : > { %v1793_v19 = vpop.f32.mrb[37].mxu0  ;;  %v1799_v20 = vadd.f32 %v2460_v17, %v2961_v7 }
 0x546   : > { %v1794_v18 = vadd.f32 %v2961_v7, %v1793_v19 }
 0x548   : > { %2581 = vtanh.f32 %v1794_v18  ;;  %v2463_v21 = vpop.f32.mrb[38].mxu0 }
 0x549   : > { %v2969_v22 = vpop.eup %2573  ;;  %v1803_v24 = vpop.f32.mrb[39].mxu0  ;;  %2583 = vtanh.f32 %v1799_v20  ;;  %v1809_v23 = vadd.f32 %v2463_v21, %v2961_v7 }
 0x54a   : > { %v1804_v25 = vadd.f32 %v2961_v7, %v1803_v24  ;;  %1886 = vrot.lane.b32.xlu0 %v2969_v22, %s2613_s26  ;;  %v2975_v26 = vpop.eup %2575 }
 0x54c   : > { %2585 = vtanh.f32 %v1804_v25  ;;  %v2466_v27 = vpop.f32.mrb[40].mxu0 }
 0x54d   : > { %v2578_v28 = vpop.eup %2577  ;;  %v1813_v29 = vpop.f32.mrb[41].mxu0  ;;  %2587 = vtanh.f32 %v1809_v23  ;;  %v1819_v31 = vadd.f32 %v2466_v27, %v2961_v7 }
 0x54e   : > { %v1814_v30 = vadd.f32 %v2961_v7, %v1813_v29  ;;  %1890 = vrot.lane.b32.xlu1 %v2578_v28, %s2613_s26  ;;  %1884 = vrot.lane.b32.xlu0 %v2975_v26, %s2613_s26  ;;  %v2580_v33 = vpop.eup %2579 }
 0x550   : > { %2589 = vtanh.f32 %v1814_v30  ;;  %v2469_v32 = vpop.f32.mrb[42].mxu0 }
 0x551   : > { %v1823_v34 = vpop.f32.mrb[43].mxu0  ;;  %2591 = vtanh.f32 %v1819_v31  ;;  %v1829_v37 = vadd.f32 %v2469_v32, %v2961_v7 }
 0x552   : > { %v2582_v35 = vpop.eup %2581  ;;  %v1824_v36 = vadd.f32 %v2961_v7, %v1823_v34  ;;  %1888 = vrot.lane.b32.xlu1 %v2580_v33, %s2613_s26 }
 0x553   : > { %1892 = vrot.lane.b32.xlu0 %v2582_v35, %s2613_s26  ;;  %v2584_v39 = vpop.eup %2583 }
 0x554   : > { %2593 = vtanh.f32 %v1824_v36  ;;  %v2472_v38 = vpop.f32.mrb[44].mxu0 }
 0x555   : > { %v1833_v40 = vpop.f32.mrb[45].mxu0  ;;  %2595 = vtanh.f32 %v1829_v37  ;;  %v1839_v43 = vadd.f32 %v2472_v38, %v2961_v7 }
 0x556   : > { %v2586_v41 = vpop.eup %2585  ;;  %v1834_v42 = vadd.f32 %v2961_v7, %v1833_v40  ;;  %1894 = vrot.lane.b32.xlu1 %v2584_v39, %s2613_s26 }
 0x557   : > { %1896 = vrot.lane.b32.xlu0 %v2586_v41, %s2613_s26  ;;  %v2588_v45 = vpop.eup %2587 }
 0x558   : > { %2597 = vtanh.f32 %v1834_v42  ;;  %v2475_v44 = vpop.f32.mrb[46].mxu0 }
 0x559   : > { %v1843_v46 = vpop.f32.mrb[47].mxu0  ;;  %2599 = vtanh.f32 %v1839_v43  ;;  %v1849_v49 = vadd.f32 %v2475_v44, %v2961_v7 }
 0x55a   : > { %v2590_v47 = vpop.eup %2589  ;;  %v1844_v48 = vadd.f32 %v2961_v7, %v1843_v46  ;;  %1898 = vrot.lane.b32.xlu1 %v2588_v45, %s2613_s26 }
 0x55b   : > { %1900 = vrot.lane.b32.xlu0 %v2590_v47, %s2613_s26  ;;  %v2592_v50 = vpop.eup %2591 }
 0x55c   : > { %2601 = vtanh.f32 %v1844_v48 }
 0x55d   : > { %2603 = vtanh.f32 %v1849_v49 }
 0x55e   : > { %v2594_v51 = vpop.eup %2593  ;;  %1902 = vrot.lane.b32.xlu1 %v2592_v50, %s2613_s26 }
 0x55f   : > { %1904 = vrot.lane.b32.xlu0 %v2594_v51, %s2613_s26  ;;  %v2996_v52 = vpop.eup %2595 }
 0x562   : > { %v2998_v53 = vpop.eup %2597  ;;  %1906 = vrot.lane.b32.xlu1 %v2996_v52, %s2613_s26 }
 0x563   : > { %1908 = vrot.lane.b32.xlu0 %v2998_v53, %s2613_s26  ;;  %v3004_v54 = vpop.eup %2599 }
 0x566   : > { %v3006_v55 = vpop.eup %2601  ;;  %1910 = vrot.lane.b32.xlu1 %v3004_v54, %s2613_s26 }
 0x567   : > { %1912 = vrot.lane.b32.xlu0 %v3006_v55, %s2613_s26  ;;  %v3012_v56 = vpop.eup %2603 }
 0x56a   : > { %1914 = vrot.lane.b32.xlu1 %v3012_v56, %s2613_s26 }
 0x5bc   : > { %v1887_v57 = vpop.permute.xlu0 %1886 }
 0x5bd   : > { %v1933_v58 = vadd.f32 %v2969_v22, %v1887_v57 }
 0x5bf   : > { %v1949_v59 = vmul.f32 0.5, %v1933_v58 }
 0x5c0   : > { %v1891_v60 = vpop.permute.xlu1 %1890  ;;  %v1885_v61 = vpop.permute.xlu0 %1884 }
 0x5c1   : > { %v2180_v62 = vclamps-f32 %v1949_v59, 1.0  ;;  %v1935_v63 = vadd.f32 %v2578_v28, %v1891_v60  ;;  %v1932_v0 = vadd.f32 %v2975_v26, %v1885_v61 }
 0x5c3   : > { %1997 = vst.msk [vmem:[%s3022_s29 + $0x8] sm:$0xff] %vm469_vm0, %v2180_v62  ;;  %v1951_v1 = vmul.f32 0.5, %v1935_v63  ;;  %v1948_v2 = vmul.f32 0.5, %v1932_v0 }
 0x5c4   : > { %v1889_v3 = vpop.permute.xlu1 %1888 }
 0x5c5   : > { %v2182_v4 = vclamps-f32 %v1951_v1, 1.0  ;;  %v2179_v5 = vclamps-f32 %v1948_v2, 1.0  ;;  %v1934_v6 = vadd.f32 %v2580_v33, %v1889_v3  ;;  %v1893_v8 = vpop.permute.xlu0 %1892 }
 0x5c6   : > { %v1936_v7 = vadd.f32 %v2582_v35, %v1893_v8 }
 0x5c7   : > { %1999 = vst.msk [vmem:[%s3022_s29 + $0x18] sm:$0xff] %vm469_vm0, %v2182_v4  ;;  %1996 = vst.msk [vmem:[%s3022_s29] sm:$0xff] %vm469_vm0, %v2179_v5  ;;  %v1950_v9 = vmul.f32 0.5, %v1934_v6 }
 0x5c8   : > { %v1952_v10 = vmul.f32 0.5, %v1936_v7  ;;  %v1895_v11 = vpop.permute.xlu1 %1894 }
 0x5c9   : > { %v2181_v12 = vclamps-f32 %v1950_v9, 1.0  ;;  %v1937_v13 = vadd.f32 %v2584_v39, %v1895_v11  ;;  %v1897_v14 = vpop.permute.xlu0 %1896 }
 0x5ca   : > { %v2183_v15 = vclamps-f32 %v1952_v10, 1.0  ;;  %v1938_v16 = vadd.f32 %v2586_v41, %v1897_v14 }
 0x5cb   : > { %1998 = vst.msk [vmem:[%s3022_s29 + $0x10] sm:$0xff] %vm469_vm0, %v2181_v12  ;;  %v1953_v17 = vmul.f32 0.5, %v1937_v13 }
 0x5cc   : > { %2000 = vst.msk [vmem:[%s3022_s29 + $0x20] sm:$0xff] %vm469_vm0, %v2183_v15  ;;  %v1954_v19 = vmul.f32 0.5, %v1938_v16  ;;  %v1899_v18 = vpop.permute.xlu1 %1898 }
 0x5cd   : > { %v2184_v20 = vclamps-f32 %v1953_v17, 1.0  ;;  %v1939_v21 = vadd.f32 %v2588_v45, %v1899_v18  ;;  %v1901_v22 = vpop.permute.xlu0 %1900 }
 0x5ce   : > { %v2185_v24 = vclamps-f32 %v1954_v19, 1.0  ;;  %v1940_v25 = vadd.f32 %v2590_v47, %v1901_v22 }
 0x5cf   : > { %2001 = vst.msk [vmem:[%s3022_s29 + $0x28] sm:$0xff] %vm469_vm0, %v2184_v20  ;;  %v1955_v23 = vmul.f32 0.5, %v1939_v21 }
 0x5d0   : > { %2002 = vst.msk [vmem:[%s3022_s29 + $0x30] sm:$0xff] %vm469_vm0, %v2185_v24  ;;  %v1956_v26 = vmul.f32 0.5, %v1940_v25  ;;  %v1903_v27 = vpop.permute.xlu1 %1902 }
 0x5d1   : > { %v2186_v28 = vclamps-f32 %v1955_v23, 1.0  ;;  %v1941_v29 = vadd.f32 %v2592_v50, %v1903_v27  ;;  %v1905_v30 = vpop.permute.xlu0 %1904 }
 0x5d2   : > { %v2187_v31 = vclamps-f32 %v1956_v26, 1.0  ;;  %v1942_v32 = vadd.f32 %v2594_v51, %v1905_v30 }
 0x5d3   : > { %2003 = vst.msk [vmem:[%s3022_s29 + $0x38] sm:$0xff] %vm469_vm0, %v2186_v28  ;;  %v1957_v33 = vmul.f32 0.5, %v1941_v29 }
 0x5d4   : > { %2004 = vst.msk [vmem:[%s3022_s29 + $0x40] sm:$0xff] %vm469_vm0, %v2187_v31  ;;  %v1958_v34 = vmul.f32 0.5, %v1942_v32  ;;  %v1907_v35 = vpop.permute.xlu1 %1906 }
 0x5d5   : > { %v2188_v36 = vclamps-f32 %v1957_v33, 1.0  ;;  %v1943_v37 = vadd.f32 %v2996_v52, %v1907_v35  ;;  %v1909_v38 = vpop.permute.xlu0 %1908 }
 0x5d6   : > { %v2189_v39 = vclamps-f32 %v1958_v34, 1.0  ;;  %v1944_v40 = vadd.f32 %v2998_v53, %v1909_v38 }
 0x5d7   : > { %2005 = vst.msk [vmem:[%s3022_s29 + $0x48] sm:$0xff] %vm469_vm0, %v2188_v36  ;;  %v1959_v41 = vmul.f32 0.5, %v1943_v37 }
 0x5d8   : > { %2006 = vst.msk [vmem:[%s3022_s29 + $0x50] sm:$0xff] %vm469_vm0, %v2189_v39  ;;  %v1960_v42 = vmul.f32 0.5, %v1944_v40  ;;  %v1911_v43 = vpop.permute.xlu1 %1910 }
 0x5d9   : > { %v2190_v44 = vclamps-f32 %v1959_v41, 1.0  ;;  %v1945_v45 = vadd.f32 %v3004_v54, %v1911_v43  ;;  %v1913_v46 = vpop.permute.xlu0 %1912 }
 0x5da   : > { %v2191_v47 = vclamps-f32 %v1960_v42, 1.0  ;;  %v1946_v48 = vadd.f32 %v3006_v55, %v1913_v46 }
 0x5db   : > { %2007 = vst.msk [vmem:[%s3022_s29 + $0x58] sm:$0xff] %vm469_vm0, %v2190_v44  ;;  %v1961_v49 = vmul.f32 0.5, %v1945_v45 }
 0x5dc   : > { %2008 = vst.msk [vmem:[%s3022_s29 + $0x60] sm:$0xff] %vm469_vm0, %v2191_v47  ;;  %v1962_v50 = vmul.f32 0.5, %v1946_v48  ;;  %v1915_v51 = vpop.permute.xlu1 %1914 }
 0x5dd   : > { %v2192_v52 = vclamps-f32 %v1961_v49, 1.0  ;;  %v1947_v53 = vadd.f32 %v3012_v56, %v1915_v51 }
 0x5de   : > { %v2193_v57 = vclamps-f32 %v1962_v50, 1.0 }
 0x5df   : > { %2009 = vst.msk [vmem:[%s3022_s29 + $0x68] sm:$0xff] %vm469_vm0, %v2192_v52  ;;  %v1963_v58 = vmul.f32 0.5, %v1947_v53 }
 0x5e0   : > { %2010 = vst.msk [vmem:[%s3022_s29 + $0x70] sm:$0xff] %vm469_vm0, %v2193_v57 }
 0x5e1   : > { %v2194_v54 = vclamps-f32 %v1963_v58, 1.0 }
 0x5e3   : > { %2011 = vst.msk [vmem:[%s3022_s29 + $0x78] sm:$0xff] %vm469_vm0, %v2194_v54 }
 0x5e4 PF: > { %s23_s25 = sadd.s32 1, %s2611_s25  }
 0x5e5   : > { %p20_p4 = scmp.ge.s32.totalorder %s23_s25, 4  }
 0x5e7   :  { %22 = sbr.rel (!%p20_p4) target bundleno = 1 (0x1), region = 102 }

</bundles_post_ra>
